<compile_context>
chip_gen: v6e
topology: v6e:2x2x1
jax: 0.10.0
libtpu: 0.0.40
codegen_flags: <defaults>
</compile_context>

<pallas_src>
import functools

import jax
import jax.numpy as jnp
from jax.experimental import pallas as pl
from jax.experimental.pallas import tpu as pltpu

LANE = 128
MAX_BLOCK_ROWS = 8192  # 8192*128*4B = 4 MiB / buffer; 4 buffers (in+out, x2) = 16 MiB


def _rehu_kernel(x_ref, o_ref, *, a, b):
    x = x_ref[...].astype(jnp.float32)
    # quadratic branch: (a/2) * relu(x)^2, clamped above at -b
    r = jnp.maximum(x, 0.0)
    quad = jnp.minimum((0.5 * a) * r * r, -b)
    # linear branch: x + b
    o_ref[...] = jnp.maximum(quad, x + b).astype(o_ref.dtype)


def rehu_pallas(x: jax.Array, d: float) -> jax.Array:
    """Applies ReHU elementwise to x (any shape) via a Pallas TPU kernel.

    Assumes d > 0 (as in the PyTorch module); otherwise the clamp range
    [0, -b] = [0, d/2] inverts and the op is ill-defined.
    """
    if d <= 0:
        raise ValueError("ReHU requires d > 0")
    a = 1.0 / d
    b = -d / 2.0

    orig_shape = x.shape
    orig_dtype = x.dtype
    n = x.size

    flat = x.reshape(-1)

    # Rows needed to view the flat data as (rows, 128).
    rows_needed = (n + LANE - 1) // LANE

    if rows_needed <= MAX_BLOCK_ROWS:
        # One block covering the whole array: no per-step overhead, and since
        # block_shape == array shape the (8,128) divisibility rule is waived.
        block_rows = rows_needed
    else:
        block_rows = MAX_BLOCK_ROWS

    n_blocks = (rows_needed + block_rows - 1) // block_rows
    padded_rows = n_blocks * block_rows
    padded_n = padded_rows * LANE

    padded = padded_n != n
    if padded:
        # Ragged tail only (rare path; the example input needs no padding).
        flat = jnp.pad(flat, (0, padded_n - n))
    x2d = flat.reshape(padded_rows, LANE)

    kernel = functools.partial(_rehu_kernel, a=a, b=b)

    out2d = pl.pallas_call(
        kernel,
        out_shape=jax.ShapeDtypeStruct((padded_rows, LANE), orig_dtype),
        grid=(n_blocks,),
        in_specs=[pl.BlockSpec((block_rows, LANE), lambda i: (i, 0))],
        out_specs=pl.BlockSpec((block_rows, LANE), lambda i: (i, 0)),
        compiler_params=pltpu.CompilerParams(
            dimension_semantics=("parallel",)
        ),
    )(x2d)

    out_flat = out2d.reshape(-1)
    if padded:
        out_flat = out_flat[:n]
    return out_flat.reshape(orig_shape)


def rehu_reference(x: jax.Array, d: float) -> jax.Array:
    # Direct transliteration of the PyTorch forward.
    a = 1.0 / d
    b = -d / 2.0
    return jnp.maximum(jnp.clip(jnp.sign(x) * a / 2.0 * x ** 2, 0.0, -b), x + b)


if __name__ == "__main__":
    key = jax.random.PRNGKey(0)
    # NCHW activation-like input, small shape consistent with the module.
    x = jax.random.normal(key, (2, 4, 16, 16), dtype=jnp.float32) * 2.0

    d = 1.0  # ReHU(d=1.0): a = 1.0, b = -0.5

    out = rehu_pallas(x, d)
    out = jax.block_until_ready(out)

    ref = rehu_reference(x, d)
    assert out.shape == x.shape
    assert jnp.allclose(out, ref, atol=1e-6, rtol=1e-6), "mismatch vs reference"

    print("KERNEL_OK")
</pallas_src>

<mosaic_0001>
module attributes {stable_mosaic.version = 11 : i64} {
  func.func @_rehu_kernel(%arg0: i32, %arg1: memref<16x128xf32, #tpu.memory_space<vmem>>, %arg2: memref<16x128xf32, #tpu.memory_space<vmem>>) attributes {dimension_semantics = [#tpu.dimension_semantics<parallel>], iteration_bounds = array<i64: 1>, scalar_prefetch = 0 : i64, scratch_operands = 0 : i64, tpu.core_type = #tpu.core_type<tc>, window_params = [{transform_indices = @transform_0, window_bounds = array<i64: 16, 128>}, {transform_indices = @transform_1, window_bounds = array<i64: 16, 128>}]} {
    %c0 = arith.constant 0 : index
    %c0_0 = arith.constant 0 : index
    %0 = vector.load %arg1[%c0, %c0_0] : memref<16x128xf32, #tpu.memory_space<vmem>>, vector<16x128xf32>
    %cst = arith.constant 0.000000e+00 : f32
    %1 = vector.broadcast %cst : f32 to vector<16x128xf32>
    %2 = arith.maximumf %0, %1 : vector<16x128xf32>
    %cst_1 = arith.constant 5.000000e-01 : f32
    %3 = vector.broadcast %cst_1 : f32 to vector<16x128xf32>
    %4 = arith.mulf %3, %2 : vector<16x128xf32>
    %5 = arith.mulf %4, %2 : vector<16x128xf32>
    %cst_2 = arith.constant 5.000000e-01 : f32
    %6 = vector.broadcast %cst_2 : f32 to vector<16x128xf32>
    %7 = arith.minimumf %5, %6 : vector<16x128xf32>
    %cst_3 = arith.constant -5.000000e-01 : f32
    %8 = vector.broadcast %cst_3 : f32 to vector<16x128xf32>
    %9 = arith.addf %0, %8 : vector<16x128xf32>
    %10 = arith.maximumf %7, %9 : vector<16x128xf32>
    %c0_4 = arith.constant 0 : index
    %c0_5 = arith.constant 0 : index
    %11 = vector.load %arg2[%c0_4, %c0_5] : memref<16x128xf32, #tpu.memory_space<vmem>>, vector<16x128xf32>
    tpu.vector_store %arg2[%c0_4, %c0_5], %10 {strides = array<i32>} : memref<16x128xf32, #tpu.memory_space<vmem>>, vector<16x128xf32>,
    return
  }
  func.func @transform_0(%arg0: i32) -> (i32, i32) {
    %c0_i32 = arith.constant 0 : i32
    %c0_i32_0 = arith.constant 0 : i32
    return %arg0, %c0_i32 : i32, i32
  }
  func.func @transform_1(%arg0: i32) -> (i32, i32) {
    %c0_i32 = arith.constant 0 : i32
    %c0_i32_0 = arith.constant 0 : i32
    return %arg0, %c0_i32 : i32, i32
  }
}

</mosaic_0001>

<bundles_post_ra>
// kernel: tpu_custom_call.1
= control target key start
LH: loop header
LB: loop body
LE: loop exit
PB: predicated region body
PF: predicated region fallthrough
CT: control target
= control target key end

     0   :  { %6 = vsyncpa [#allocation3], 0  ;;  %s130_s0 = inlined_call_operand.hbm [shape: f32[16,128], index: 0, kind: input, shape index: {}]   ;;  %s131_s1 = inlined_call_operand.hbm [shape: f32[16,128], index: 1, kind: output, shape index: {}]  }
   0x1   :  { %7 = vsyncpa [#allocation4], 0  ;;  %s104_s6 = smov [#allocation2]  }
   0x2   :  { %s13_s7 = sshll.u32 %s104_s6, 4  ;;  %s14_s7 = int_to_ptr.vmem [resolvable:$true] %s13_s7 }
   0x3   :  { %s68_s8 = scalar_lea.vmem %s14_s7, 256  ;;  %p73_p1 = scmp.lt.s32.totalorder %s14_s7, %s14_s7 }
   0x4   :  { %p69_p0 = scmp.ne.s32.totalorder %s14_s7, %s68_s8  ;;  %p74_p2 = scmp.lt.s32.totalorder %s68_s8, %s68_s8 }
   0x6   :  { %p75_p3 = por %p74_p2, %p73_p1 }
   0x8   :  { %p76_p4 = pnand %p75_p3, %p69_p0 }
   0xa   :  { %79 = shalt.err (!%p76_p4)
}
   0xb   :  { %s105_s9 = smov 128   ;;  %s106_s10 = smov 8  }
   0xc   :  { %19 = dma.hbm_to_vmem [thread:$0]  %s130_s0, 256, %s14_s7, [#allocation3], %s105_s9, %s105_s9, %s106_s10  }
   0xd   :  { %100 = dma.done.wait [#allocation3], 256  }
   0xe   :  { %101 = vsyncadd [#allocation3], 4294967040  ;;  %v23_v0 = vld [vmem:[#allocation2] sm:$0xff]  ;;  %v24_v1 = vld [vmem:[#allocation2 + $0x8] sm:$0xff]  ;;  %s107_s13 = smov [#allocation5]  }
   0xf   :  { %v25_v2 = vmax.f32 %v23_v0, 0.0  ;;  %v26_v3 = vmax.f32 %v24_v1, 0.0  ;;  %v33_v7 = vadd.f32 -0.5, %v23_v0  ;;  %v34_v9 = vadd.f32 -0.5, %v24_v1  ;;  %s44_s14 = sshll.u32 %s107_s13, 4  ;;  %s45_s14 = int_to_ptr.vmem [resolvable:$true] %s44_s14 }
  0x10   :  { %s80_s0 = scalar_lea.vmem %s45_s14, 256  ;;  %p85_p6 = scmp.lt.s32.totalorder %s45_s14, %s45_s14 }
  0x11   :  { %v27_v4 = vmul.f32 0.5, %v25_v2  ;;  %v28_v5 = vmul.f32 0.5, %v26_v3  ;;  %p81_p5 = scmp.ne.s32.totalorder %s45_s14, %s80_s0  ;;  %p86_p7 = scmp.lt.s32.totalorder %s80_s0, %s80_s0 }
  0x13   :  { %v29_v6 = vmul.f32 %v27_v4, %v25_v2  ;;  %v30_v8 = vmul.f32 %v28_v5, %v26_v3  ;;  %p87_p8 = por %p86_p7, %p85_p6 }
  0x15   :  { %v31_v10 = vmin.f32 %v29_v6, 0.5  ;;  %v32_v11 = vmin.f32 %v30_v8, 0.5  ;;  %p88_p9 = pnand %p87_p8, %p81_p5 }
  0x17   :  { %v35_v12 = vmax.f32 %v31_v10, %v33_v7  ;;  %v36_v13 = vmax.f32 %v32_v11, %v34_v9 }
  0x19   :  { %37 = vst [vmem:[#allocation5] sm:$0xff] %v35_v12  ;;  %38 = vst [vmem:[#allocation5 + $0x8] sm:$0xff] %v36_v13 }
  0x1a   :  { %91 = shalt.err (!%p88_p9)
}
  0x1b   :  { %50 = dma.vmem_to_hbm [thread:$0]  %s45_s14, 256, %s131_s1, [#allocation4], %s105_s9, %s105_s9, %s106_s10  }
  0x1c   :  { %102 = dma.done.wait [#allocation4], 256  }
  0x1d   :  { %103 = vsyncadd [#allocation4], 4294967040 }
  0x1e   :  { %54 = vsyncpa [#allocation3], 1 }
  0x1f   :  { %55 = vsyncpa [#allocation4], 1 }

</bundles_post_ra>
